<compile_context>
chip_gen: v6e
topology: v6e:2x2x1
jax: 0.10.0
libtpu: 0.0.40
codegen_flags: <defaults>
</compile_context>

<pallas_src>
import numpy as np
import jax
import jax.numpy as jnp
from jax.experimental import pallas as pl
from jax.experimental.pallas import tpu as pltpu

_VMEM = pl.BlockSpec(memory_space=pltpu.MemorySpace.VMEM)


# ------------------------------ Pallas kernel -------------------------------

def _decoder_kernel(x_ref, m1_ref, b1_ref, m2_ref, b2_ref, o_ref):
    # x : (TB, 256) f32   m1: (256, 512) bf16   b1: (1, 512) f32
    # m2: (512, 512) bf16 b2: (1, 512) f32      o : (TB, 512) f32
    x16 = x_ref[...].astype(jnp.bfloat16)                       # tiny VPU cast
    h = jnp.dot(x16, m1_ref[...],
                preferred_element_type=jnp.float32) + b1_ref[...]
    h = jnp.maximum(h, 0.0)                                     # ReLU1 (f32 VPU)
    h16 = h.astype(jnp.bfloat16)
    o_ref[...] = jnp.dot(h16, m2_ref[...],
                         preferred_element_type=jnp.float32) + b2_ref[...]


# ------------------ one-time weight -> dense-operator prep -------------------

def _sel(n_in, n_out, k, stride):
    """S[p, ki, i] = 1 where output index i == stride*p + ki (ConvTranspose, pad=0)."""
    p = jnp.arange(n_in)[:, None, None]
    kk = jnp.arange(k)[None, :, None]
    i = jnp.arange(n_out)[None, None, :]
    return (i == stride * p + kk).astype(jnp.float32)           # (n_in, k, n_out)


def build_dense_ops(params, hin=4, win=4, lane=128):
    """Lower both ConvTranspose2d layers to dense matrices (trace/init time)."""
    w1, b1 = params["w_dc1"], params["b_dc1"]    # (16, 8, 5, 5), (8,)
    w2, b2 = params["w_dc2"], params["b_dc2"]    # (8, 1, 5, 5),  (1,)
    cin1, cout1, k1, _ = w1.shape
    cin2, cout2, k2, _ = w2.shape
    assert cin2 == cout1

    # deconv1: stride 1, padding 0
    h1, w1o = hin + k1 - 1, win + k1 - 1                         # 8, 8
    # deconv2: stride 2, padding 0, output_padding 1
    s2, op2 = 2, 1
    h2, w2o = (h1 - 1) * s2 + k2 + op2, (w1o - 1) * s2 + k2 + op2   # 20, 20

    S1h, S1w = _sel(hin, h1, k1, 1), _sel(win, w1o, k1, 1)
    S2h, S2w = _sel(h1, h2, k2, s2), _sel(w1o, w2o, k2, s2)

    # M[ci, p, q, co, i, j] = sum_{ki,kj} W[ci, co, ki, kj] * [i==s*p+ki][j==s*q+kj]
    m1 = jnp.einsum('abkl,pki,qlj->apqbij', w1, S1h, S1w)
    m1 = m1.reshape(cin1 * hin * win, cout1 * h1 * w1o)          # (256, 512)
    m2 = jnp.einsum('abkl,pki,qlj->apqbij', w2, S2h, S2w)
    m2 = m2.reshape(cin2 * h1 * w1o, cout2 * h2 * w2o)           # (512, 400)

    b1_full = jnp.repeat(b1, h1 * w1o)[None, :]                  # (1, 512) f32
    n_out = cout2 * h2 * w2o                                     # 400
    n_pad = ((n_out + lane - 1) // lane) * lane                  # 512 (lane-dense)
    m2 = jnp.pad(m2, ((0, 0), (0, n_pad - n_out)))
    b2_full = jnp.pad(jnp.repeat(b2, h2 * w2o), (0, n_pad - n_out))[None, :]

    # bf16 weights: halve HBM->VMEM bytes on the DMA-bound path; f32 accumulation
    # in the kernel keeps accuracy well inside tolerance.
    return {"m1": m1.astype(jnp.bfloat16),
            "b1": b1_full.astype(jnp.float32),
            "m2": m2.astype(jnp.bfloat16),
            "b2": b2_full.astype(jnp.float32),
            "n_out": n_out, "out_chw": (cout2, h2, w2o)}


# ------------------------------ forward wrapper ------------------------------

def decoder_forward(x_nchw, ops, *, batch_tile=256, grid_threshold=512):
    b = x_nchw.shape[0]
    xf = x_nchw.reshape(b, -1).astype(jnp.float32)               # NCHW flatten == (ci,p,q)
    k_in = ops["m1"].shape[0]
    n_pad = ops["m2"].shape[1]

    if b <= grid_threshold:
        # Small batch: single VMEM-resident block, no grid (grid steps would only
        # add ~0.35 us each on a few-us kernel).
        bp = max(8, ((b + 7) // 8) * 8)                          # pad to 8 sublanes
        xp = jnp.pad(xf, ((0, bp - b), (0, 0)))
        out = pl.pallas_call(
            _decoder_kernel,
            out_shape=jax.ShapeDtypeStruct((bp, n_pad), jnp.float32),
            in_specs=[_VMEM] * 5,
            out_specs=_VMEM,
        )(xp, ops["m1"], ops["b1"], ops["m2"], ops["b2"])
    else:
        # Large batch: grid over batch rows; weight BlockSpecs use a constant
        # index_map so M1/b1/M2/b2 are DMA'd once and stay VMEM-resident.
        tb = batch_tile
        bp = ((b + tb - 1) // tb) * tb
        xp = jnp.pad(xf, ((0, bp - b), (0, 0)))
        out = pl.pallas_call(
            _decoder_kernel,
            out_shape=jax.ShapeDtypeStruct((bp, n_pad), jnp.float32),
            grid=(bp // tb,),
            in_specs=[
                pl.BlockSpec((tb, k_in), lambda i: (i, 0)),
                pl.BlockSpec(ops["m1"].shape, lambda i: (0, 0)),
                pl.BlockSpec(ops["b1"].shape, lambda i: (0, 0)),
                pl.BlockSpec(ops["m2"].shape, lambda i: (0, 0)),
                pl.BlockSpec(ops["b2"].shape, lambda i: (0, 0)),
            ],
            out_specs=pl.BlockSpec((tb, n_pad), lambda i: (i, 0)),
            compiler_params=pltpu.CompilerParams(
                dimension_semantics=("parallel",)),                # v7x: 2 TCs
        )(xp, ops["m1"], ops["b1"], ops["m2"], ops["b2"])

    co, ho, wo = ops["out_chw"]
    return out[:b, :ops["n_out"]].reshape(b, co, ho, wo)


# --------------------------- params & pure-JAX ref ---------------------------

def init_params(key):
    ks = jax.random.split(key, 4)

    def u(k, shape, fan):
        bound = 1.0 / float(np.sqrt(fan))
        return jax.random.uniform(k, shape, jnp.float32, -bound, bound)

    return {
        "w_dc1": u(ks[0], (16, 8, 5, 5), 8 * 25),   # ConvTranspose2d weight (Cin, Cout, kH, kW)
        "b_dc1": u(ks[1], (8,), 8 * 25),
        "w_dc2": u(ks[2], (8, 1, 5, 5), 1 * 25),
        "b_dc2": u(ks[3], (1,), 1 * 25),
    }


def ref_forward(x, p):
    """Reference ConvTranspose2d via lhs-dilated regular correlation (f32)."""
    def deconv(z, w, bias, stride, out_pad):
        k = w.shape[-1]
        w_ref = jnp.flip(jnp.transpose(w, (1, 0, 2, 3)), (2, 3))   # (Cout, Cin, kH, kW), flipped
        pad = [(k - 1, k - 1 + out_pad), (k - 1, k - 1 + out_pad)]
        y = jax.lax.conv_general_dilated(
            z, w_ref, window_strides=(1, 1), padding=pad,
            lhs_dilation=(stride, stride),
            dimension_numbers=("NCHW", "OIHW", "NCHW"),
            precision=jax.lax.Precision.HIGHEST)
        return y + bias[None, :, None, None]

    y = jnp.maximum(deconv(x, p["w_dc1"], p["b_dc1"], 1, 0), 0.0)   # deconv1 + ReLU
    return deconv(y, p["w_dc2"], p["b_dc2"], 2, 1)                  # deconv2


# ----------------------------------- main ------------------------------------

if __name__ == "__main__":
    key = jax.random.PRNGKey(0)
    kx, kp, kx2 = jax.random.split(key, 3)
    params = init_params(kp)
    ops = build_dense_ops(params, hin=4, win=4)     # one-time weight lowering

    # --- small batch: single-block path ---
    B = 2
    x = jax.random.normal(kx, (B, 16, 4, 4), jnp.float32)   # LeNet bottleneck (B,16,4,4)
    out = jax.block_until_ready(decoder_forward(x, ops))
    assert out.shape == (B, 1, 20, 20) and out.dtype == jnp.float32
    ref = jax.block_until_ready(ref_forward(x, params))
    np.testing.assert_allclose(np.asarray(out), np.asarray(ref), rtol=2e-2, atol=2e-2)

    # --- larger batch: batch-grid path (constant-index weight specs, "parallel") ---
    B2 = 600
    x2 = jax.random.normal(kx2, (B2, 16, 4, 4), jnp.float32)
    out2 = jax.block_until_ready(decoder_forward(x2, ops))
    assert out2.shape == (B2, 1, 20, 20)
    ref2 = jax.block_until_ready(ref_forward(x2, params))
    np.testing.assert_allclose(np.asarray(out2), np.asarray(ref2), rtol=2e-2, atol=2e-2)

    print("KERNEL_OK")
</pallas_src>

<mosaic_0001>
module attributes {stable_mosaic.version = 11 : i64} {
  func.func @_decoder_kernel(%arg0: memref<8x256xf32, #tpu.memory_space<vmem>>, %arg1: memref<256x512xbf16, #tpu.memory_space<vmem>>, %arg2: memref<1x512xf32, #tpu.memory_space<vmem>>, %arg3: memref<512x512xbf16, #tpu.memory_space<vmem>>, %arg4: memref<1x512xf32, #tpu.memory_space<vmem>>, %arg5: memref<8x512xf32, #tpu.memory_space<vmem>>) attributes {dimension_semantics = [], scalar_prefetch = 0 : i64, scratch_operands = 0 : i64, tpu.core_type = #tpu.core_type<tc>} {
    %c0 = arith.constant 0 : index
    %c0_0 = arith.constant 0 : index
    %0 = vector.load %arg0[%c0, %c0_0] : memref<8x256xf32, #tpu.memory_space<vmem>>, vector<8x256xf32>
    %1 = arith.truncf %0 : vector<8x256xf32> to vector<8x256xbf16>
    %c0_1 = arith.constant 0 : index
    %c0_2 = arith.constant 0 : index
    %2 = vector.load %arg1[%c0_1, %c0_2] : memref<256x512xbf16, #tpu.memory_space<vmem>>, vector<256x512xbf16>
    %cst = arith.constant dense<0.000000e+00> : vector<8x512xf32>
    %3 = tpu.matmul %1, %2, %cst {dimension_numbers = #tpu.dot_dimension_numbers<[1], [0], [0], [1], [0, 0, 1, 1], [], []>} : vector<8x256xbf16>, vector<256x512xbf16>, vector<8x512xf32> -> vector<8x512xf32>
    %c0_3 = arith.constant 0 : index
    %c0_4 = arith.constant 0 : index
    %4 = vector.load %arg2[%c0_3, %c0_4] : memref<1x512xf32, #tpu.memory_space<vmem>>, vector<1x512xf32>
    %5 = vector.broadcast %4 : vector<1x512xf32> to vector<8x512xf32>
    %6 = arith.addf %3, %5 : vector<8x512xf32>
    %cst_5 = arith.constant 0.000000e+00 : f32
    %7 = vector.broadcast %cst_5 : f32 to vector<8x512xf32>
    %8 = arith.maximumf %6, %7 : vector<8x512xf32>
    %9 = arith.truncf %8 : vector<8x512xf32> to vector<8x512xbf16>
    %c0_6 = arith.constant 0 : index
    %c0_7 = arith.constant 0 : index
    %10 = vector.load %arg3[%c0_6, %c0_7] : memref<512x512xbf16, #tpu.memory_space<vmem>>, vector<512x512xbf16>
    %cst_8 = arith.constant dense<0.000000e+00> : vector<8x512xf32>
    %11 = tpu.matmul %9, %10, %cst_8 {dimension_numbers = #tpu.dot_dimension_numbers<[1], [0], [0], [1], [0, 0, 1, 1], [], []>} : vector<8x512xbf16>, vector<512x512xbf16>, vector<8x512xf32> -> vector<8x512xf32>
    %c0_9 = arith.constant 0 : index
    %c0_10 = arith.constant 0 : index
    %12 = vector.load %arg4[%c0_9, %c0_10] : memref<1x512xf32, #tpu.memory_space<vmem>>, vector<1x512xf32>
    %13 = vector.broadcast %12 : vector<1x512xf32> to vector<8x512xf32>
    %14 = arith.addf %11, %13 : vector<8x512xf32>
    %c0_11 = arith.constant 0 : index
    %c0_12 = arith.constant 0 : index
    %15 = vector.load %arg5[%c0_11, %c0_12] : memref<8x512xf32, #tpu.memory_space<vmem>>, vector<8x512xf32>
    tpu.vector_store %arg5[%c0_11, %c0_12], %14 {strides = array<i32>} : memref<8x512xf32, #tpu.memory_space<vmem>>, vector<8x512xf32>,
    return
  }
}

</mosaic_0001>

<bundles_post_ra>
// kernel: tpu_custom_call.1
= control target key start
LH: loop header
LB: loop body
LE: loop exit
PB: predicated region body
PF: predicated region fallthrough
CT: control target
= control target key end

     0   :  { %10 = vsyncpa [#allocation3], 0  ;;  %s2233_s0 = inlined_call_operand.hbm [shape: f32[8,256], index: 0, kind: input, shape index: {}]   ;;  %s2234_s1 = inlined_call_operand.hbm [shape: bf16[256,512], index: 1, kind: input, shape index: {}]   ;;  %s2235_s2 = inlined_call_operand.hbm [shape: f32[1,512], index: 2, kind: input, shape index: {}]   ;;  %s2236_s3 = inlined_call_operand.hbm [shape: bf16[512,512], index: 3, kind: input, shape index: {}]   ;;  %s2237_s4 = inlined_call_operand.vmem [shape: f32[1,512], index: 4, kind: input, shape index: {}]   ;;  %s2238_s5 = inlined_call_operand.hbm [shape: f32[8,512], index: 5, kind: output, shape index: {}]  }
   0x1   :  { %11 = vsyncpa [#allocation6], 0 }
   0x2   :  { %12 = vsyncpa [#allocation9], 0 }
   0x3   :  { %13 = vsyncpa [#allocation4], 0  ;;  %s2142_s18 = smov [#allocation5]  }
   0x4   :  { %s29_s19 = sshll.u32 %s2142_s18, 4  ;;  %s30_s19 = int_to_ptr.vmem [resolvable:$true] %s29_s19 }
   0x5   :  { %s2042_s20 = scalar_lea.vmem %s30_s19, 8192  ;;  %p2047_p1 = scmp.lt.s32.totalorder %s30_s19, %s30_s19 }
   0x6   :  { %p2043_p0 = scmp.ne.s32.totalorder %s30_s19, %s2042_s20  ;;  %p2048_p2 = scmp.lt.s32.totalorder %s2042_s20, %s2042_s20 }
   0x8   :  { %p2049_p3 = por %p2048_p2, %p2047_p1 }
   0xa   :  { %p2050_p4 = pnand %p2049_p3, %p2043_p0 }
   0xc   :  { %2053 = shalt.err (!%p2050_p4)
}
   0xd   :  { %s2143_s21 = smov 256   ;;  %s2144_s22 = smov 16  }
   0xe   :  { %35 = dma.hbm_to_vmem [thread:$0]  %s2234_s1, 8192, %s30_s19, [#allocation6], %s2143_s21, %s2143_s21, %s2144_s22  }
   0xf   :  { %s2145_s25 = smov [#allocation2]   ;;  %s2146_s27 = smov [#allocation7]  }
  0x10   :  { %s20_s26 = sshll.u32 %s2145_s25, 4  ;;  %s42_s28 = sshll.u32 %s2146_s27, 4  ;;  %s21_s26 = int_to_ptr.vmem [resolvable:$true] %s20_s26  ;;  %s43_s28 = int_to_ptr.vmem [resolvable:$true] %s42_s28 }
  0x11   :  { %s2062_s29 = scalar_lea.vmem %s21_s26, 256  ;;  %p2067_p6 = scmp.lt.s32.totalorder %s21_s26, %s21_s26 }
  0x12   :  { %p2063_p5 = scmp.ne.s32.totalorder %s21_s26, %s2062_s29  ;;  %p2068_p7 = scmp.lt.s32.totalorder %s2062_s29, %s2062_s29 }
  0x14   :  { %p2069_p8 = por %p2068_p7, %p2067_p6 }
  0x16   :  { %p2070_p9 = pnand %p2069_p8, %p2063_p5 }
  0x18   :  { %2073 = shalt.err (!%p2070_p9)
}
  0x19   :  { %23 = dma.hbm_to_vmem [thread:$0]  %s2233_s0, 256, %s21_s26, [#allocation3]  }
  0x1a   :  { %s2082_s7 = scalar_lea.vmem %s43_s28, 64  ;;  %p2087_p11 = scmp.lt.s32.totalorder %s43_s28, %s43_s28 }
  0x1b   :  { %p2083_p10 = scmp.ne.s32.totalorder %s43_s28, %s2082_s7  ;;  %p2088_p12 = scmp.lt.s32.totalorder %s2082_s7, %s2082_s7 }
  0x1d   :  { %p2089_p13 = por %p2088_p12, %p2087_p11 }
  0x1f   :  { %p2090_p0 = pnand %p2089_p13, %p2083_p10 }
  0x21   :  { %2093 = shalt.err (!%p2090_p0)
}
  0x22   :  { %45 = dma.hbm_to_vmem [thread:$0]  %s2235_s2, 64, %s43_s28, [#allocation6]  }
  0x23   :  { %s2147_s9 = smov [#allocation8]  }
  0x24   :  { %s51_s10 = sshll.u32 %s2147_s9, 4  ;;  %s52_s10 = int_to_ptr.vmem [resolvable:$true] %s51_s10 }
  0x25   :  { %s2102_s11 = scalar_lea.vmem %s52_s10, 16384  ;;  %p2107_p2 = scmp.lt.s32.totalorder %s52_s10, %s52_s10 }
  0x26   :  { %p2103_p1 = scmp.ne.s32.totalorder %s52_s10, %s2102_s11  ;;  %p2108_p3 = scmp.lt.s32.totalorder %s2102_s11, %s2102_s11 }
  0x28   :  { %p2109_p4 = por %p2108_p3, %p2107_p2 }
  0x2a   :  { %p2110_p5 = pnand %p2109_p4, %p2103_p1 }
  0x2c   :  { %2113 = shalt.err (!%p2110_p5)
}
  0x2d   :  { %57 = dma.hbm_to_vmem [thread:$0]  %s2236_s3, 16384, %s52_s10, [#allocation9], %s2143_s21, %s2143_s21, %s2144_s22  }
  0x2e   :  { %2134 = dma.done.wait [#allocation3], 256  }
  0x2f   :  { %2135 = vsyncadd [#allocation3], 4294967040 }
  0x30   :  { %2136 = dma.done.wait [#allocation6], 8256  }
  0x31   :  { %2137 = vsyncadd [#allocation6], 4294959040 }
  0x32   :  { %2138 = dma.done.wait [#allocation9], 16384  }
  0x33   :  { %2139 = vsyncadd [#allocation9], 4294950912  ;;  %v1746_v0 = vld [vmem:[#allocation5 + $0xe4] ss:$16 sps:$4 sm:$0xff]   ;;  %v1748_v1 = vld [vmem:[#allocation5 + $0xec] ss:$16 sps:$4 sm:$0xff]  }
  0x34   :  { %482 = vmatprep.subr.bf16.mxu0 %v1746_v0  ;;  %v1750_v2 = vld [vmem:[#allocation5 + $0xe0] ss:$16 sps:$4 sm:$0xff]   ;;  %v1751_v3 = vld [vmem:[#allocation5 + $0xe8] ss:$16 sps:$4 sm:$0xff]   ;;  %523 = vmatprep.subr.bf16.mxu1 %v1748_v1  ;;  %v1752_v4 = vld [vmem:[#allocation5 + $0xc4] ss:$16 sps:$4 sm:$0xff]  }
  0x35   :  { %483 = vmatpush1.bf16.msra.mxu0 %v1750_v2  ;;  %524 = vmatpush1.bf16.msra.mxu1 %v1751_v3  ;;  %v1754_v5 = vld [vmem:[#allocation5 + $0xcc] ss:$16 sps:$4 sm:$0xff]   ;;  %v1756_v6 = vld [vmem:[#allocation5 + $0xc0] ss:$16 sps:$4 sm:$0xff]   ;;  %v1757_v7 = vld [vmem:[#allocation5 + $0xc8] ss:$16 sps:$4 sm:$0xff]  }
  0x36   :  { %484 = vmatprep.subr.bf16.mxu0 %v1752_v4  ;;  %525 = vmatprep.subr.bf16.mxu1 %v1754_v5  ;;  %v1758_v8 = vld [vmem:[#allocation5 + $0xa4] ss:$16 sps:$4 sm:$0xff]   ;;  %v1760_v9 = vld [vmem:[#allocation5 + $0xac] ss:$16 sps:$4 sm:$0xff]   ;;  %v1762_v10 = vld [vmem:[#allocation5 + $0xa0] ss:$16 sps:$4 sm:$0xff]  }
  0x37   :  { %v1763_v11 = vld [vmem:[#allocation5 + $0xa8] ss:$16 sps:$4 sm:$0xff]   ;;  %v1764_v12 = vld [vmem:[#allocation5 + $0x84] ss:$16 sps:$4 sm:$0xff]   ;;  %v1766_v13 = vld [vmem:[#allocation5 + $0x8c] ss:$16 sps:$4 sm:$0xff]  }
  0x38   :  { %v1768_v14 = vld [vmem:[#allocation5 + $0x80] ss:$16 sps:$4 sm:$0xff]   ;;  %v1769_v15 = vld [vmem:[#allocation5 + $0x88] ss:$16 sps:$4 sm:$0xff]   ;;  %v1770_v16 = vld [vmem:[#allocation5 + $0x64] ss:$16 sps:$4 sm:$0xff]  }
  0x39   :  { %485 = vmatpush1.bf16.msra.mxu0 %v1756_v6  ;;  %526 = vmatpush1.bf16.msra.mxu1 %v1757_v7  ;;  %v1772_v17 = vld [vmem:[#allocation5 + $0x6c] ss:$16 sps:$4 sm:$0xff]   ;;  %v1774_v18 = vld [vmem:[#allocation5 + $0x60] ss:$16 sps:$4 sm:$0xff]   ;;  %v1775_v19 = vld [vmem:[#allocation5 + $0x68] ss:$16 sps:$4 sm:$0xff]  }
  0x3a   :  { %486 = vmatprep.subr.bf16.mxu0 %v1758_v8  ;;  %527 = vmatprep.subr.bf16.mxu1 %v1760_v9  ;;  %v1776_v20 = vld [vmem:[#allocation5 + $0x44] ss:$16 sps:$4 sm:$0xff]   ;;  %v1778_v21 = vld [vmem:[#allocation5 + $0x4c] ss:$16 sps:$4 sm:$0xff]   ;;  %v1780_v22 = vld [vmem:[#allocation5 + $0x40] ss:$16 sps:$4 sm:$0xff]  }
  0x3b   :  { %v1781_v23 = vld [vmem:[#allocation5 + $0x48] ss:$16 sps:$4 sm:$0xff]   ;;  %v1782_v24 = vld [vmem:[#allocation5 + $0x24] ss:$16 sps:$4 sm:$0xff]   ;;  %v1784_v25 = vld [vmem:[#allocation5 + $0x2c] ss:$16 sps:$4 sm:$0xff]  }
  0x3c   :  { %v1786_v26 = vld [vmem:[#allocation5 + $0x20] ss:$16 sps:$4 sm:$0xff]   ;;  %v1787_v27 = vld [vmem:[#allocation5 + $0x28] ss:$16 sps:$4 sm:$0xff]   ;;  %v1788_v28 = vld [vmem:[#allocation5 + $0x4] ss:$16 sps:$4 sm:$0xff]  }
  0x3d   :  { %487 = vmatpush1.bf16.msra.mxu0 %v1762_v10  ;;  %528 = vmatpush1.bf16.msra.mxu1 %v1763_v11  ;;  %v1790_v29 = vld [vmem:[#allocation5 + $0xc] ss:$16 sps:$4 sm:$0xff]   ;;  %v1792_v30 = vld [vmem:[#allocation5] ss:$16 sps:$4 sm:$0xff]   ;;  %v1793_v31 = vld [vmem:[#allocation5 + $0x8] ss:$16 sps:$4 sm:$0xff]  }
  0x3e   :  { %488 = vmatprep.subr.bf16.mxu0 %v1764_v12  ;;  %529 = vmatprep.subr.bf16.mxu1 %v1766_v13  ;;  %v1794_v32 = vld [vmem:[#allocation5 + $0x1e4] ss:$16 sps:$4 sm:$0xff]   ;;  %v1796_v33 = vld [vmem:[#allocation5 + $0x1ec] ss:$16 sps:$4 sm:$0xff]   ;;  %v1798_v34 = vld [vmem:[#allocation5 + $0x1e0] ss:$16 sps:$4 sm:$0xff]  }
  0x3f   :  { %v1799_v35 = vld [vmem:[#allocation5 + $0x1e8] ss:$16 sps:$4 sm:$0xff]   ;;  %v1800_v36 = vld [vmem:[#allocation5 + $0x1c4] ss:$16 sps:$4 sm:$0xff]   ;;  %v1802_v37 = vld [vmem:[#allocation5 + $0x1cc] ss:$16 sps:$4 sm:$0xff]  }
  0x40   :  { %v1804_v38 = vld [vmem:[#allocation5 + $0x1c0] ss:$16 sps:$4 sm:$0xff]   ;;  %v1805_v39 = vld [vmem:[#allocation5 + $0x1c8] ss:$16 sps:$4 sm:$0xff]   ;;  %v1806_v40 = vld [vmem:[#allocation5 + $0x1a4] ss:$16 sps:$4 sm:$0xff]  }
  0x41   :  { %489 = vmatpush1.bf16.msra.mxu0 %v1768_v14  ;;  %530 = vmatpush1.bf16.msra.mxu1 %v1769_v15  ;;  %v1808_v41 = vld [vmem:[#allocation5 + $0x1ac] ss:$16 sps:$4 sm:$0xff]   ;;  %v1810_v42 = vld [vmem:[#allocation5 + $0x1a0] ss:$16 sps:$4 sm:$0xff]   ;;  %v1811_v43 = vld [vmem:[#allocation5 + $0x1a8] ss:$16 sps:$4 sm:$0xff]  }
  0x42   :  { %490 = vmatprep.subr.bf16.mxu0 %v1770_v16  ;;  %531 = vmatprep.subr.bf16.mxu1 %v1772_v17  ;;  %v1812_v44 = vld [vmem:[#allocation5 + $0x184] ss:$16 sps:$4 sm:$0xff]   ;;  %v1814_v45 = vld [vmem:[#allocation5 + $0x18c] ss:$16 sps:$4 sm:$0xff]   ;;  %v1816_v48 = vld [vmem:[#allocation5 + $0x180] ss:$16 sps:$4 sm:$0xff]  }
  0x43   :  { %v73_v46 = vld [vmem:[#allocation2 + $0x8] sm:$0xff]  ;;  %v1818_v50 = vld [vmem:[#allocation5 + $0x164] ss:$16 sps:$4 sm:$0xff]   ;;  %v1822_v52 = vld [vmem:[#allocation5 + $0x160] ss:$16 sps:$4 sm:$0xff]  }
  0x44   :  { %v75_v47 = vpack.c.bf16 %v73_v46, %v73_v46  ;;  %v1817_v49 = vld [vmem:[#allocation5 + $0x188] ss:$16 sps:$4 sm:$0xff]   ;;  %v1820_v51 = vld [vmem:[#allocation5 + $0x16c] ss:$16 sps:$4 sm:$0xff]   ;;  %v1824_v54 = vld [vmem:[#allocation5 + $0x144] ss:$16 sps:$4 sm:$0xff]  }
  0x45   :  { %491 = vmatpush1.bf16.msra.mxu0 %v1774_v18  ;;  %532 = vmatpush1.bf16.msra.mxu1 %v1775_v19  ;;  %v1823_v53 = vld [vmem:[#allocation5 + $0x168] ss:$16 sps:$4 sm:$0xff]   ;;  %v1826_v55 = vld [vmem:[#allocation5 + $0x14c] ss:$16 sps:$4 sm:$0xff]   ;;  %v1828_v56 = vld [vmem:[#allocation5 + $0x140] ss:$16 sps:$4 sm:$0xff]  }
  0x46   :  { %492 = vmatprep.subr.bf16.mxu0 %v1776_v20  ;;  %533 = vmatprep.subr.bf16.mxu1 %v1778_v21  ;;  %v1829_v57 = vld [vmem:[#allocation5 + $0x148] ss:$16 sps:$4 sm:$0xff]   ;;  %v1830_v58 = vld [vmem:[#allocation5 + $0x124] ss:$16 sps:$4 sm:$0xff]   ;;  %v1832_v59 = vld [vmem:[#allocation5 + $0x12c] ss:$16 sps:$4 sm:$0xff]  }
  0x47   :  { %514 = vmatprep.mubr.bf16.mxu0 %v75_v47  ;;  %555 = vmatprep.mubr.bf16.mxu1 %v75_v47  ;;  %v1834_v60 = vld [vmem:[#allocation5 + $0x120] ss:$16 sps:$4 sm:$0xff]   ;;  %v1835_v61 = vld [vmem:[#allocation5 + $0x128] ss:$16 sps:$4 sm:$0xff]   ;;  %v1836_v62 = vld [vmem:[#allocation5 + $0x104] ss:$16 sps:$4 sm:$0xff]  }
  0x48   :  { %v1838_v63 = vld [vmem:[#allocation5 + $0x10c] ss:$16 sps:$4 sm:$0xff]   ;;  %v1840_v0 = vld [vmem:[#allocation5 + $0x100] ss:$16 sps:$4 sm:$0xff]   ;;  %v1841_v1 = vld [vmem:[#allocation5 + $0x108] ss:$16 sps:$4 sm:$0xff]  }
  0x49   :  { %493 = vmatpush1.bf16.msra.mxu0 %v1780_v22  ;;  %534 = vmatpush1.bf16.msra.mxu1 %v1781_v23  ;;  %v72_v2 = vld [vmem:[#allocation2] sm:$0xff]  ;;  %v1844_v3 = vld [vmem:[#allocation8 + $0xe4] ss:$16 sps:$4 sm:$0xff]  }
  0x4a   :  { %494 = vmatprep.subr.bf16.mxu0 %v1782_v24  ;;  %535 = vmatprep.subr.bf16.mxu1 %v1784_v25  ;;  %v1847_v4 = vld [vmem:[#allocation8 + $0x2e4] ss:$16 sps:$4 sm:$0xff]   ;;  %v74_v5 = vpack.c.bf16 %v72_v2, %v72_v2  ;;  %v1842_v6 = vld [vmem:[#allocation8 + $0xe0] ss:$16 sps:$4 sm:$0xff]  }
  0x4b   :  { %v1845_v7 = vld [vmem:[#allocation8 + $0x2e0] ss:$16 sps:$4 sm:$0xff]   ;;  %v1850_v8 = vld [vmem:[#allocation8 + $0xc4] ss:$16 sps:$4 sm:$0xff]  }
  0x4c   :  { %v1853_v9 = vld [vmem:[#allocation8 + $0x2c4] ss:$16 sps:$4 sm:$0xff]   ;;  %v1848_v10 = vld [vmem:[#allocation8 + $0xc0] ss:$16 sps:$4 sm:$0xff]  }
  0x4d   :  { %495 = vmatpush1.bf16.msra.mxu0 %v1786_v26  ;;  %536 = vmatpush1.bf16.msra.mxu1 %v1787_v27  ;;  %v1851_v11 = vld [vmem:[#allocation8 + $0x2c0] ss:$16 sps:$4 sm:$0xff]   ;;  %v1856_v12 = vld [vmem:[#allocation8 + $0xa4] ss:$16 sps:$4 sm:$0xff]  }
  0x4e   :  { %496 = vmatprep.subr.bf16.mxu0 %v1788_v28  ;;  %537 = vmatprep.subr.bf16.mxu1 %v1790_v29  ;;  %v1859_v13 = vld [vmem:[#allocation8 + $0x2a4] ss:$16 sps:$4 sm:$0xff]   ;;  %v1854_v14 = vld [vmem:[#allocation8 + $0xa0] ss:$16 sps:$4 sm:$0xff]  }
  0x4f   :  { %v1857_v15 = vld [vmem:[#allocation8 + $0x2a0] ss:$16 sps:$4 sm:$0xff]   ;;  %v1862_v16 = vld [vmem:[#allocation8 + $0x84] ss:$16 sps:$4 sm:$0xff]  }
  0x50   :  { %v1865_v17 = vld [vmem:[#allocation8 + $0x284] ss:$16 sps:$4 sm:$0xff]   ;;  %v1860_v18 = vld [vmem:[#allocation8 + $0x80] ss:$16 sps:$4 sm:$0xff]  }
  0x51   :  { %497 = vmatpush1.bf16.msra.mxu0 %v1792_v30  ;;  %538 = vmatpush1.bf16.msra.mxu1 %v1793_v31  ;;  %v1863_v19 = vld [vmem:[#allocation8 + $0x280] ss:$16 sps:$4 sm:$0xff]   ;;  %v1868_v20 = vld [vmem:[#allocation8 + $0x64] ss:$16 sps:$4 sm:$0xff]  }
  0x52   :  { %498 = vmatprep.subr.bf16.mxu0 %v1794_v32  ;;  %539 = vmatprep.subr.bf16.mxu1 %v1796_v33  ;;  %v1871_v21 = vld [vmem:[#allocation8 + $0x264] ss:$16 sps:$4 sm:$0xff]   ;;  %v1866_v22 = vld [vmem:[#allocation8 + $0x60] ss:$16 sps:$4 sm:$0xff]  }
  0x53   :  { %v1869_v23 = vld [vmem:[#allocation8 + $0x260] ss:$16 sps:$4 sm:$0xff]   ;;  %v1874_v24 = vld [vmem:[#allocation8 + $0x44] ss:$16 sps:$4 sm:$0xff]  }
  0x54   :  { %v1877_v25 = vld [vmem:[#allocation8 + $0x244] ss:$16 sps:$4 sm:$0xff]   ;;  %v1872_v26 = vld [vmem:[#allocation8 + $0x40] ss:$16 sps:$4 sm:$0xff]  }
  0x55   :  { %499 = vmatpush2.bf16.msra.mxu0 %v1798_v34  ;;  %540 = vmatpush2.bf16.msra.mxu1 %v1799_v35  ;;  %v1875_v27 = vld [vmem:[#allocation8 + $0x240] ss:$16 sps:$4 sm:$0xff]   ;;  %v1880_v28 = vld [vmem:[#allocation8 + $0x24] ss:$16 sps:$4 sm:$0xff]  }
  0x56   :  { %500 = vmatprep.subr.bf16.mxu0 %v1800_v36  ;;  %541 = vmatprep.subr.bf16.mxu1 %v1802_v37  ;;  %v1883_v29 = vld [vmem:[#allocation8 + $0x224] ss:$16 sps:$4 sm:$0xff]   ;;  %v1878_v30 = vld [vmem:[#allocation8 + $0x20] ss:$16 sps:$4 sm:$0xff]  }
  0x57   :  { %v1881_v31 = vld [vmem:[#allocation8 + $0x220] ss:$16 sps:$4 sm:$0xff]   ;;  %v1886_v32 = vld [vmem:[#allocation8 + $0x4] ss:$16 sps:$4 sm:$0xff]  }
  0x58   :  { %v1889_v33 = vld [vmem:[#allocation8 + $0x204] ss:$16 sps:$4 sm:$0xff]   ;;  %v1884_v34 = vld [vmem:[#allocation8] ss:$16 sps:$4 sm:$0xff]  }
  0x59   :  { %501 = vmatpush2.bf16.msra.mxu0 %v1804_v38  ;;  %542 = vmatpush2.bf16.msra.mxu1 %v1805_v39  ;;  %v1887_v35 = vld [vmem:[#allocation8 + $0x200] ss:$16 sps:$4 sm:$0xff]   ;;  %v1892_v36 = vld [vmem:[#allocation8 + $0x1e4] ss:$16 sps:$4 sm:$0xff]  }
  0x5a   :  { %502 = vmatprep.subr.bf16.mxu0 %v1806_v40  ;;  %543 = vmatprep.subr.bf16.mxu1 %v1808_v41  ;;  %v1895_v37 = vld [vmem:[#allocation8 + $0x3e4] ss:$16 sps:$4 sm:$0xff]   ;;  %v1890_v38 = vld [vmem:[#allocation8 + $0x1e0] ss:$16 sps:$4 sm:$0xff]  }
  0x5b   :  { %v1893_v39 = vld [vmem:[#allocation8 + $0x3e0] ss:$16 sps:$4 sm:$0xff]   ;;  %v1898_v40 = vld [vmem:[#allocation8 + $0x1c4] ss:$16 sps:$4 sm:$0xff]  }
  0x5c   :  { %v1901_v41 = vld [vmem:[#allocation8 + $0x3c4] ss:$16 sps:$4 sm:$0xff]   ;;  %v1902_v46 = vld [vmem:[#allocation8 + $0x1a0] ss:$16 sps:$4 sm:$0xff]  }
  0x5d   :  { %503 = vmatpush2.bf16.msra.mxu0 %v1810_v42  ;;  %544 = vmatpush2.bf16.msra.mxu1 %v1811_v43  ;;  %v1896_v42 = vld [vmem:[#allocation8 + $0x1c0] ss:$16 sps:$4 sm:$0xff]  }
  0x5e   :  { %504 = vmatprep.subr.bf16.mxu0 %v1812_v44  ;;  %545 = vmatprep.subr.bf16.mxu1 %v1814_v45  ;;  %v1899_v43 = vld [vmem:[#allocation8 + $0x3c0] ss:$16 sps:$4 sm:$0xff]   ;;  %v1904_v44 = vld [vmem:[#allocation8 + $0x1a4] ss:$16 sps:$4 sm:$0xff]  }
  0x5f   :  { %v1907_v45 = vld [vmem:[#allocation8 + $0x3a4] ss:$16 sps:$4 sm:$0xff]   ;;  %v1905_v47 = vld [vmem:[#allocation8 + $0x3a0] ss:$16 sps:$4 sm:$0xff]  }
  0x60   :  { %v1932_v2 = vld [vmem:[#allocation8 + $0x100] ss:$16 sps:$4 sm:$0xff]  }
  0x61   :  { %505 = vmatpush2.bf16.msra.mxu0 %v1816_v48  ;;  %546 = vmatpush2.bf16.msra.mxu1 %v1817_v49  ;;  %v1910_v48 = vld [vmem:[#allocation8 + $0x184] ss:$16 sps:$4 sm:$0xff]  }
  0x62   :  { %506 = vmatprep.subr.bf16.mxu0 %v1818_v50  ;;  %547 = vmatprep.subr.bf16.mxu1 %v1820_v51  ;;  %v1913_v49 = vld [vmem:[#allocation8 + $0x384] ss:$16 sps:$4 sm:$0xff]   ;;  %v1908_v50 = vld [vmem:[#allocation8 + $0x180] ss:$16 sps:$4 sm:$0xff]  }
  0x63   :  { %v1911_v51 = vld [vmem:[#allocation8 + $0x380] ss:$16 sps:$4 sm:$0xff]  }
  0x65   :  { %507 = vmatpush2.bf16.msra.mxu0 %v1822_v52  ;;  %548 = vmatpush2.bf16.msra.mxu1 %v1823_v53  ;;  %v1916_v52 = vld [vmem:[#allocation8 + $0x164] ss:$16 sps:$4 sm:$0xff]  }
  0x66   :  { %508 = vmatprep.subr.bf16.mxu0 %v1824_v54  ;;  %549 = vmatprep.subr.bf16.mxu1 %v1826_v55  ;;  %v1919_v53 = vld [vmem:[#allocation8 + $0x364] ss:$16 sps:$4 sm:$0xff]   ;;  %v1914_v54 = vld [vmem:[#allocation8 + $0x160] ss:$16 sps:$4 sm:$0xff]  }
  0x67   :  { %v1917_v55 = vld [vmem:[#allocation8 + $0x360] ss:$16 sps:$4 sm:$0xff]  }
  0x69   :  { %509 = vmatpush2.bf16.msra.mxu0 %v1828_v56  ;;  %550 = vmatpush2.bf16.msra.mxu1 %v1829_v57  ;;  %v1922_v56 = vld [vmem:[#allocation8 + $0x144] ss:$16 sps:$4 sm:$0xff]  }
  0x6a   :  { %510 = vmatprep.subr.bf16.mxu0 %v1830_v58  ;;  %551 = vmatprep.subr.bf16.mxu1 %v1832_v59  ;;  %v1925_v57 = vld [vmem:[#allocation8 + $0x344] ss:$16 sps:$4 sm:$0xff]   ;;  %v1920_v58 = vld [vmem:[#allocation8 + $0x140] ss:$16 sps:$4 sm:$0xff]  }
  0x6b   :  { %v1923_v59 = vld [vmem:[#allocation8 + $0x340] ss:$16 sps:$4 sm:$0xff]  }
  0x6d   :  { %511 = vmatpush2.bf16.msra.mxu0 %v1834_v60  ;;  %552 = vmatpush2.bf16.msra.mxu1 %v1835_v61  ;;  %v1928_v60 = vld [vmem:[#allocation8 + $0x124] ss:$16 sps:$4 sm:$0xff]  }
  0x6e   :  { %512 = vmatprep.subr.bf16.mxu0 %v1836_v62  ;;  %553 = vmatprep.subr.bf16.mxu1 %v1838_v63  ;;  %v1931_v61 = vld [vmem:[#allocation8 + $0x324] ss:$16 sps:$4 sm:$0xff]   ;;  %v1926_v62 = vld [vmem:[#allocation8 + $0x120] ss:$16 sps:$4 sm:$0xff]  }
  0x6f   :  { %v1929_v63 = vld [vmem:[#allocation8 + $0x320] ss:$16 sps:$4 sm:$0xff]  }
  0x71   :  { %513 = vmatpush2.bf16.msra.mxu0 %v1840_v0  ;;  %554 = vmatpush2.bf16.msra.mxu1 %v1841_v1  ;;  %v1934_v0 = vld [vmem:[#allocation8 + $0x104] ss:$16 sps:$4 sm:$0xff]  }
  0x72   :  { %1362 = vmatprep.subr.bf16.mxu0 %v1844_v3  ;;  %1403 = vmatprep.subr.bf16.mxu1 %v1847_v4  ;;  %v1937_v1 = vld [vmem:[#allocation8 + $0x304] ss:$16 sps:$4 sm:$0xff]   ;;  %v1935_v3 = vld [vmem:[#allocation8 + $0x300] ss:$16 sps:$4 sm:$0xff]   ;;  %v1940_v4 = vld [vmem:[#allocation8 + $0xec] ss:$16 sps:$4 sm:$0xff]  }
  0x74   :  { %515 = vmatmul.mubr.bf16.vlgmr.msra.gmra.mxu0 %v74_v5  ;;  %556 = vmatmul.mubr.bf16.vlgmr.msra.gmra.mxu1 %v74_v5  ;;  %v1943_v5 = vld [vmem:[#allocation8 + $0x2ec] ss:$16 sps:$4 sm:$0xff]  }
  0x75   :  { %1363 = vmatpush1.bf16.msra.mxu0 %v1842_v6  ;;  %1404 = vmatpush1.bf16.msra.mxu1 %v1845_v7  ;;  %v142_v6 = vlaneseq }
  0x76   :  { %1364 = vmatprep.subr.bf16.mxu0 %v1850_v8  ;;  %1405 = vmatprep.subr.bf16.mxu1 %v1853_v9 }
  0x77   :  { %v2197_v7 = vshrl.u32 %v142_v6, 7  ;;  %v1989_v6 = vld [vmem:[#allocation8 + $0x3e8] ss:$16 sps:$4 sm:$0xff]  }
  0x79   :  { %1365 = vmatpush1.bf16.msra.mxu0 %v1848_v10  ;;  %1406 = vmatpush1.bf16.msra.mxu1 %v1851_v11  ;;  %v144_v8 = vsub.s32 0, %v2197_v7  ;;  %v152_v9 = vsub.s32 2, %v2197_v7  ;;  %v140_v10 = vld [vmem:[#allocation7] sm:$0xf]  ;;  %v148_v11 = vsub.s32 1, %v2197_v7 }
  0x7a   :  { %1366 = vmatprep.subr.bf16.mxu0 %v1856_v12  ;;  %1407 = vmatprep.subr.bf16.mxu1 %v1859_v13  ;;  %v156_v12 = vsub.s32 3, %v2197_v7 }
  0x7b   :  { %v145_v13 = vrot.slane %v140_v10, %v144_v8 }
  0x7d   :  { %1367 = vmatpush1.bf16.msra.mxu0 %v1854_v14  ;;  %1408 = vmatpush1.bf16.msra.mxu1 %v1857_v15  ;;  %v153_v14 = vrot.slane %v140_v10, %v152_v9  ;;  %v149_v15 = vrot.slane %v140_v10, %v148_v11 }
  0x7e   :  { %1368 = vmatprep.subr.bf16.mxu0 %v1862_v16  ;;  %1409 = vmatprep.subr.bf16.mxu1 %v1865_v17  ;;  %v157_v16 = vrot.slane %v140_v10, %v156_v12  ;;  %v1994_v10 = vld [vmem:[#allocation8 + $0x1cc] ss:$16 sps:$4 sm:$0xff]  }
  0x81   :  { %1369 = vmatpush1.bf16.msra.mxu0 %v1860_v18  ;;  %1410 = vmatpush1.bf16.msra.mxu1 %v1863_v19 }
  0x82   :  { %1370 = vmatprep.subr.bf16.mxu0 %v1868_v20  ;;  %1411 = vmatprep.subr.bf16.mxu1 %v1871_v21 }
  0x85   :  { %1371 = vmatpush1.bf16.msra.mxu0 %v1866_v22  ;;  %1412 = vmatpush1.bf16.msra.mxu1 %v1869_v23 }
  0x86   :  { %1372 = vmatprep.subr.bf16.mxu0 %v1874_v24  ;;  %1413 = vmatprep.subr.bf16.mxu1 %v1877_v25 }
  0x89   :  { %1373 = vmatpush1.bf16.msra.mxu0 %v1872_v26  ;;  %1414 = vmatpush1.bf16.msra.mxu1 %v1875_v27 }
  0x8a   :  { %1374 = vmatprep.subr.bf16.mxu0 %v1880_v28  ;;  %1415 = vmatprep.subr.bf16.mxu1 %v1883_v29 }
  0x8d   :  { %1375 = vmatpush1.bf16.msra.mxu0 %v1878_v30  ;;  %1416 = vmatpush1.bf16.msra.mxu1 %v1881_v31 }
  0x8e   :  { %1376 = vmatprep.subr.bf16.mxu0 %v1886_v32  ;;  %1417 = vmatprep.subr.bf16.mxu1 %v1889_v33 }
  0x91   :  { %1377 = vmatpush1.bf16.msra.mxu0 %v1884_v34  ;;  %1418 = vmatpush1.bf16.msra.mxu1 %v1887_v35 }
  0x92   :  { %1378 = vmatprep.subr.bf16.mxu0 %v1892_v36  ;;  %1419 = vmatprep.subr.bf16.mxu1 %v1895_v37  ;;  %v1938_v36 = vld [vmem:[#allocation8 + $0xe8] ss:$16 sps:$4 sm:$0xff]  }
  0x93   :  { %v1941_v37 = vld [vmem:[#allocation8 + $0x2e8] ss:$16 sps:$4 sm:$0xff]  }
  0x95   :  { %1379 = vmatpush2.bf16.msra.mxu0 %v1890_v38  ;;  %1420 = vmatpush2.bf16.msra.mxu1 %v1893_v39  ;;  %v1946_v39 = vld [vmem:[#allocation8 + $0xcc] ss:$16 sps:$4 sm:$0xff]  }
  0x96   :  { %1380 = vmatprep.subr.bf16.mxu0 %v1898_v40  ;;  %1421 = vmatprep.subr.bf16.mxu1 %v1901_v41  ;;  %v1949_v40 = vld [vmem:[#allocation8 + $0x2cc] ss:$16 sps:$4 sm:$0xff]   ;;  %v1944_v41 = vld [vmem:[#allocation8 + $0xc8] ss:$16 sps:$4 sm:$0xff]  }
  0x99   :  { %1381 = vmatpush2.bf16.msra.mxu0 %v1896_v42  ;;  %1422 = vmatpush2.bf16.msra.mxu1 %v1899_v43  ;;  %v1947_v42 = vld [vmem:[#allocation8 + $0x2c8] ss:$16 sps:$4 sm:$0xff]   ;;  %v1952_v43 = vld [vmem:[#allocation8 + $0xac] ss:$16 sps:$4 sm:$0xff]  }
  0x9a   :  { %1382 = vmatprep.subr.bf16.mxu0 %v1904_v44  ;;  %1423 = vmatprep.subr.bf16.mxu1 %v1907_v45  ;;  %v1955_v44 = vld [vmem:[#allocation8 + $0x2ac] ss:$16 sps:$4 sm:$0xff]   ;;  %v1950_v45 = vld [vmem:[#allocation8 + $0xa8] ss:$16 sps:$4 sm:$0xff]  }
  0x9d   :  { %1383 = vmatpush2.bf16.msra.mxu0 %v1902_v46  ;;  %1424 = vmatpush2.bf16.msra.mxu1 %v1905_v47  ;;  %v1953_v46 = vld [vmem:[#allocation8 + $0x2a8] ss:$16 sps:$4 sm:$0xff]   ;;  %v1958_v47 = vld [vmem:[#allocation8 + $0x8c] ss:$16 sps:$4 sm:$0xff]  }
  0x9e   :  { %1384 = vmatprep.subr.bf16.mxu0 %v1910_v48  ;;  %1425 = vmatprep.subr.bf16.mxu1 %v1913_v49  ;;  %v1961_v48 = vld [vmem:[#allocation8 + $0x28c] ss:$16 sps:$4 sm:$0xff]   ;;  %v1956_v49 = vld [vmem:[#allocation8 + $0x88] ss:$16 sps:$4 sm:$0xff]  }
  0xa1   :  { %1385 = vmatpush2.bf16.msra.mxu0 %v1908_v50  ;;  %1426 = vmatpush2.bf16.msra.mxu1 %v1911_v51  ;;  %v1959_v50 = vld [vmem:[#allocation8 + $0x288] ss:$16 sps:$4 sm:$0xff]   ;;  %v1964_v51 = vld [vmem:[#allocation8 + $0x6c] ss:$16 sps:$4 sm:$0xff]  }
  0xa2   :  { %1386 = vmatprep.subr.bf16.mxu0 %v1916_v52  ;;  %1427 = vmatprep.subr.bf16.mxu1 %v1919_v53  ;;  %v1967_v52 = vld [vmem:[#allocation8 + $0x26c] ss:$16 sps:$4 sm:$0xff]   ;;  %v1962_v53 = vld [vmem:[#allocation8 + $0x68] ss:$16 sps:$4 sm:$0xff]  }
  0xa5   :  { %1387 = vmatpush2.bf16.msra.mxu0 %v1914_v54  ;;  %1428 = vmatpush2.bf16.msra.mxu1 %v1917_v55  ;;  %v1965_v54 = vld [vmem:[#allocation8 + $0x268] ss:$16 sps:$4 sm:$0xff]   ;;  %v1970_v55 = vld [vmem:[#allocation8 + $0x4c] ss:$16 sps:$4 sm:$0xff]  }
  0xa6   :  { %1388 = vmatprep.subr.bf16.mxu0 %v1922_v56  ;;  %1429 = vmatprep.subr.bf16.mxu1 %v1925_v57  ;;  %v1973_v56 = vld [vmem:[#allocation8 + $0x24c] ss:$16 sps:$4 sm:$0xff]   ;;  %v1968_v57 = vld [vmem:[#allocation8 + $0x48] ss:$16 sps:$4 sm:$0xff]  }
  0xa9   :  { %1389 = vmatpush2.bf16.msra.mxu0 %v1920_v58  ;;  %1430 = vmatpush2.bf16.msra.mxu1 %v1923_v59  ;;  %v1971_v58 = vld [vmem:[#allocation8 + $0x248] ss:$16 sps:$4 sm:$0xff]   ;;  %v1976_v59 = vld [vmem:[#allocation8 + $0x2c] ss:$16 sps:$4 sm:$0xff]  }
  0xaa   :  { %1390 = vmatprep.subr.bf16.mxu0 %v1928_v60  ;;  %1431 = vmatprep.subr.bf16.mxu1 %v1931_v61  ;;  %v1979_v60 = vld [vmem:[#allocation8 + $0x22c] ss:$16 sps:$4 sm:$0xff]   ;;  %v1974_v61 = vld [vmem:[#allocation8 + $0x28] ss:$16 sps:$4 sm:$0xff]  }
  0xad   :  { %1391 = vmatpush2.bf16.msra.mxu0 %v1926_v62  ;;  %1432 = vmatpush2.bf16.msra.mxu1 %v1929_v63  ;;  %v1977_v62 = vld [vmem:[#allocation8 + $0x228] ss:$16 sps:$4 sm:$0xff]   ;;  %v1982_v63 = vld [vmem:[#allocation8 + $0xc] ss:$16 sps:$4 sm:$0xff]  }
  0xae   :  { %1392 = vmatprep.subr.bf16.mxu0 %v1934_v0  ;;  %1433 = vmatprep.subr.bf16.mxu1 %v1937_v1  ;;  %v1985_v0 = vld [vmem:[#allocation8 + $0x20c] ss:$16 sps:$4 sm:$0xff]   ;;  %v1980_v1 = vld [vmem:[#allocation8 + $0x8] ss:$16 sps:$4 sm:$0xff]  }
  0xb1   :  { %1393 = vmatpush2.bf16.msra.mxu0 %v1932_v2  ;;  %1434 = vmatpush2.bf16.msra.mxu1 %v1935_v3  ;;  %v1983_v2 = vld [vmem:[#allocation8 + $0x208] ss:$16 sps:$4 sm:$0xff]   ;;  %v1988_v3 = vld [vmem:[#allocation8 + $0x1ec] ss:$16 sps:$4 sm:$0xff]  }
  0xb2   :  { %1444 = vmatprep.subr.bf16.mxu0 %v1940_v4  ;;  %1485 = vmatprep.subr.bf16.mxu1 %v1943_v5  ;;  %v1991_v4 = vld [vmem:[#allocation8 + $0x3ec] ss:$16 sps:$4 sm:$0xff]   ;;  %v1986_v5 = vld [vmem:[#allocation8 + $0x1e8] ss:$16 sps:$4 sm:$0xff]  }
 0x134   :  { %v516_v17 = vpop.f32.mrf.mxu0  ;;  %v557_v18 = vpop.f32.mrf.mxu1 }
 0x135   :  { %v517_v19 = vadd.f32 %v516_v17, %v145_v13  ;;  %v558_v20 = vadd.f32 %v557_v18, %v153_v14  ;;  %v1997_v13 = vld [vmem:[#allocation8 + $0x3cc] ss:$16 sps:$4 sm:$0xff]   ;;  %v1992_v14 = vld [vmem:[#allocation8 + $0x1c8] ss:$16 sps:$4 sm:$0xff]  }
 0x136   :  { %v518_v21 = vpop.f32.mrf.mxu0  ;;  %v559_v22 = vpop.f32.mrf.mxu1  ;;  %v2003_v17 = vld [vmem:[#allocation8 + $0x3ac] ss:$16 sps:$4 sm:$0xff]   ;;  %v1998_v18 = vld [vmem:[#allocation8 + $0x1a8] ss:$16 sps:$4 sm:$0xff]  }
 0x137   :  { %v566_v23 = vmax.f32 %v558_v20, 0.0  ;;  %v519_v24 = vadd.f32 %v518_v21, %v149_v15  ;;  %v560_v25 = vadd.f32 %v559_v22, %v157_v16  ;;  %v564_v26 = vmax.f32 %v517_v19, 0.0  ;;  %v1995_v15 = vld [vmem:[#allocation8 + $0x3c8] ss:$16 sps:$4 sm:$0xff]   ;;  %v2000_v16 = vld [vmem:[#allocation8 + $0x1ac] ss:$16 sps:$4 sm:$0xff]  }
 0x138   :  { %v520_v27 = vpop.f32.mrf.mxu0  ;;  %v561_v28 = vpop.f32.mrf.mxu1  ;;  %v2001_v19 = vld [vmem:[#allocation8 + $0x3a8] ss:$16 sps:$4 sm:$0xff]   ;;  %v2006_v20 = vld [vmem:[#allocation8 + $0x18c] ss:$16 sps:$4 sm:$0xff]  }
 0x139   :  { %v565_v29 = vmax.f32 %v519_v24, 0.0  ;;  %v567_v30 = vmax.f32 %v560_v25, 0.0  ;;  %v2211_v31 = vpack.c.bf16 %v566_v23, %v566_v23  ;;  %v2213_v38 = vpack.c.bf16 %v564_v26, %v564_v26  ;;  %v2009_v21 = vld [vmem:[#allocation8 + $0x38c] ss:$16 sps:$4 sm:$0xff]   ;;  %v2004_v22 = vld [vmem:[#allocation8 + $0x188] ss:$16 sps:$4 sm:$0xff]  }
 0x13a   :  { %v521_v32 = vpop.f32.mrf.mxu0  ;;  %v562_v33 = vpop.f32.mrf.mxu1  ;;  %v2007_v23 = vld [vmem:[#allocation8 + $0x388] ss:$16 sps:$4 sm:$0xff]   ;;  %v2012_v24 = vld [vmem:[#allocation8 + $0x16c] ss:$16 sps:$4 sm:$0xff]  }
 0x13b   :  { %v569_v34 = vpack.c.bf16 %v565_v29, %v565_v29  ;;  %v571_v35 = vpack.c.bf16 %v567_v30, %v567_v30  ;;  %v2015_v25 = vld [vmem:[#allocation8 + $0x36c] ss:$16 sps:$4 sm:$0xff]   ;;  %v2010_v26 = vld [vmem:[#allocation8 + $0x168] ss:$16 sps:$4 sm:$0xff]  }
 0x13c   :  { %v2013_v27 = vld [vmem:[#allocation8 + $0x368] ss:$16 sps:$4 sm:$0xff]   ;;  %v2018_v28 = vld [vmem:[#allocation8 + $0x14c] ss:$16 sps:$4 sm:$0xff]  }
 0x13d   :  { %1394 = vmatprep.mubr.bf16.mxu0 %v569_v34  ;;  %1435 = vmatprep.mubr.bf16.mxu1 %v571_v35  ;;  %v2021_v29 = vld [vmem:[#allocation8 + $0x34c] ss:$16 sps:$4 sm:$0xff]   ;;  %v2016_v30 = vld [vmem:[#allocation8 + $0x148] ss:$16 sps:$4 sm:$0xff]  }
 0x13e   :  { %1395 = vmatmul.mubr.bf16.vlgmr.msra.gmra.mxu0 %v2213_v38  ;;  %1436 = vmatmul.mubr.bf16.vlgmr.msra.gmra.mxu1 %v2211_v31  ;;  %v2019_v32 = vld [vmem:[#allocation8 + $0x348] ss:$16 sps:$4 sm:$0xff]   ;;  %v2024_v33 = vld [vmem:[#allocation8 + $0x12c] ss:$16 sps:$4 sm:$0xff]  }
 0x13f   :  { %1445 = vmatpush1.bf16.msra.mxu0 %v1938_v36  ;;  %1486 = vmatpush1.bf16.msra.mxu1 %v1941_v37  ;;  %v2025_v36 = vld [vmem:[#allocation8 + $0x328] ss:$16 sps:$4 sm:$0xff]   ;;  %v2030_v37 = vld [vmem:[#allocation8 + $0x10c] ss:$16 sps:$4 sm:$0xff]  }
 0x140   :  { %1476 = vmatprep.mubr.bf16.mxu0 %v569_v34  ;;  %1517 = vmatprep.mubr.bf16.mxu1 %v571_v35  ;;  %v2027_v34 = vld [vmem:[#allocation8 + $0x32c] ss:$16 sps:$4 sm:$0xff]   ;;  %v2022_v35 = vld [vmem:[#allocation8 + $0x128] ss:$16 sps:$4 sm:$0xff]  }
 0x141   :  { %1446 = vmatprep.subr.bf16.mxu0 %v1946_v39  ;;  %1487 = vmatprep.subr.bf16.mxu1 %v1949_v40  ;;  %v2033_v39 = vld [vmem:[#allocation8 + $0x30c] ss:$16 sps:$4 sm:$0xff]   ;;  %v2028_v40 = vld [vmem:[#allocation8 + $0x108] ss:$16 sps:$4 sm:$0xff]  }
 0x143   :  { %1447 = vmatpush1.bf16.msra.mxu0 %v1944_v41  ;;  %1488 = vmatpush1.bf16.msra.mxu1 %v1947_v42  ;;  %v2031_v41 = vld [vmem:[#allocation8 + $0x308] ss:$16 sps:$4 sm:$0xff]   ;;  %v700_v42 = vld [vmem:[%s2237_s4] sm:$0xf]  ;;  %s2148_s4 = smov [#allocation10]  }
 0x144   :  { %1448 = vmatprep.subr.bf16.mxu0 %v1952_v43  ;;  %1489 = vmatprep.subr.bf16.mxu1 %v1955_v44  ;;  %v705_v43 = vrot.slane %v700_v42, %v144_v8  ;;  %v709_v44 = vrot.slane %v700_v42, %v148_v11  ;;  %v713_v8 = vrot.slane %v700_v42, %v152_v9  ;;  %s1536_s13 = sshll.u32 %s2148_s4, 4  ;;  %s1537_s13 = int_to_ptr.vmem [resolvable:$true] %s1536_s13 }
 0x145   :  { %v717_v11 = vrot.slane %v700_v42, %v156_v12  ;;  %s2114_s14 = scalar_lea.vmem %s1537_s13, 512  ;;  %p2119_p7 = scmp.lt.s32.totalorder %s1537_s13, %s1537_s13 }
 0x146   :  { %p2115_p6 = scmp.ne.s32.totalorder %s1537_s13, %s2114_s14  ;;  %p2120_p8 = scmp.lt.s32.totalorder %s2114_s14, %s2114_s14 }
 0x147   :  { %1449 = vmatpush1.bf16.msra.mxu0 %v1950_v45  ;;  %1490 = vmatpush1.bf16.msra.mxu1 %v1953_v46 }
 0x148   :  { %1450 = vmatprep.subr.bf16.mxu0 %v1958_v47  ;;  %1491 = vmatprep.subr.bf16.mxu1 %v1961_v48  ;;  %p2121_p9 = por %p2120_p8, %p2119_p7 }
 0x14a   :  { %p2122_p10 = pnand %p2121_p9, %p2115_p6 }
 0x14b   :  { %1451 = vmatpush1.bf16.msra.mxu0 %v1956_v49  ;;  %1492 = vmatpush1.bf16.msra.mxu1 %v1959_v50 }
 0x14c   :  { %1452 = vmatprep.subr.bf16.mxu0 %v1964_v51  ;;  %1493 = vmatprep.subr.bf16.mxu1 %v1967_v52 }
 0x14f   :  { %1453 = vmatpush1.bf16.msra.mxu0 %v1962_v53  ;;  %1494 = vmatpush1.bf16.msra.mxu1 %v1965_v54 }
 0x150   :  { %1454 = vmatprep.subr.bf16.mxu0 %v1970_v55  ;;  %1495 = vmatprep.subr.bf16.mxu1 %v1973_v56 }
 0x153   :  { %1455 = vmatpush1.bf16.msra.mxu0 %v1968_v57  ;;  %1496 = vmatpush1.bf16.msra.mxu1 %v1971_v58 }
 0x154   :  { %1456 = vmatprep.subr.bf16.mxu0 %v1976_v59  ;;  %1497 = vmatprep.subr.bf16.mxu1 %v1979_v60 }
 0x157   :  { %1457 = vmatpush1.bf16.msra.mxu0 %v1974_v61  ;;  %1498 = vmatpush1.bf16.msra.mxu1 %v1977_v62 }
 0x158   :  { %1458 = vmatprep.subr.bf16.mxu0 %v1982_v63  ;;  %1499 = vmatprep.subr.bf16.mxu1 %v1985_v0 }
 0x15b   :  { %1459 = vmatpush1.bf16.msra.mxu0 %v1980_v1  ;;  %1500 = vmatpush1.bf16.msra.mxu1 %v1983_v2 }
 0x15c   :  { %1460 = vmatprep.subr.bf16.mxu0 %v1988_v3  ;;  %1501 = vmatprep.subr.bf16.mxu1 %v1991_v4 }
 0x15f   :  { %1461 = vmatpush2.bf16.msra.mxu0 %v1986_v5  ;;  %1502 = vmatpush2.bf16.msra.mxu1 %v1989_v6 }
 0x160   :  { %1462 = vmatprep.subr.bf16.mxu0 %v1994_v10  ;;  %1503 = vmatprep.subr.bf16.mxu1 %v1997_v13 }
 0x163   :  { %1463 = vmatpush2.bf16.msra.mxu0 %v1992_v14  ;;  %1504 = vmatpush2.bf16.msra.mxu1 %v1995_v15 }
 0x164   :  { %1464 = vmatprep.subr.bf16.mxu0 %v2000_v16  ;;  %1505 = vmatprep.subr.bf16.mxu1 %v2003_v17 }
 0x167   :  { %1465 = vmatpush2.bf16.msra.mxu0 %v1998_v18  ;;  %1506 = vmatpush2.bf16.msra.mxu1 %v2001_v19 }
 0x168   :  { %1466 = vmatprep.subr.bf16.mxu0 %v2006_v20  ;;  %1507 = vmatprep.subr.bf16.mxu1 %v2009_v21 }
 0x16b   :  { %1467 = vmatpush2.bf16.msra.mxu0 %v2004_v22  ;;  %1508 = vmatpush2.bf16.msra.mxu1 %v2007_v23 }
 0x16c   :  { %1468 = vmatprep.subr.bf16.mxu0 %v2012_v24  ;;  %1509 = vmatprep.subr.bf16.mxu1 %v2015_v25 }
 0x16f   :  { %1469 = vmatpush2.bf16.msra.mxu0 %v2010_v26  ;;  %1510 = vmatpush2.bf16.msra.mxu1 %v2013_v27 }
 0x170   :  { %1470 = vmatprep.subr.bf16.mxu0 %v2018_v28  ;;  %1511 = vmatprep.subr.bf16.mxu1 %v2021_v29 }
 0x173   :  { %1471 = vmatpush2.bf16.msra.mxu0 %v2016_v30  ;;  %1512 = vmatpush2.bf16.msra.mxu1 %v2019_v32 }
 0x174   :  { %1472 = vmatprep.subr.bf16.mxu0 %v2024_v33  ;;  %1513 = vmatprep.subr.bf16.mxu1 %v2027_v34 }
 0x177   :  { %1473 = vmatpush2.bf16.msra.mxu0 %v2022_v35  ;;  %1514 = vmatpush2.bf16.msra.mxu1 %v2025_v36 }
 0x178   :  { %1474 = vmatprep.subr.bf16.mxu0 %v2030_v37  ;;  %1515 = vmatprep.subr.bf16.mxu1 %v2033_v39 }
 0x17b   :  { %1475 = vmatpush2.bf16.msra.mxu0 %v2028_v40  ;;  %1516 = vmatpush2.bf16.msra.mxu1 %v2031_v41 }
 0x17e   :  { %1477 = vmatmul.mubr.bf16.vlgmr.msra.gmra.mxu0 %v2213_v38  ;;  %1518 = vmatmul.mubr.bf16.vlgmr.msra.gmra.mxu1 %v2211_v31 }
 0x1fe   :  { %v1396_v45 = vpop.f32.mrf.mxu0  ;;  %v1437_v46 = vpop.f32.mrf.mxu1 }
 0x1ff   :  { %v1397_v47 = vadd.f32 %v1396_v45, %v705_v43 }
 0x200   :  { %v1398_v48 = vpop.f32.mrf.mxu0  ;;  %v1439_v49 = vpop.f32.mrf.mxu1 }
 0x201   :  { %v1438_v50 = vadd.f32 %v1437_v46, %v1397_v47  ;;  %v1399_v51 = vadd.f32 %v1398_v48, %v709_v44 }
 0x202   :  { %v1400_v38 = vpop.f32.mrf.mxu0  ;;  %v1441_v52 = vpop.f32.mrf.mxu1 }
 0x203   :  { %1526 = vst [vmem:[#allocation10] sm:$0xff] %v1438_v50  ;;  %v1440_v31 = vadd.f32 %v1439_v49, %v1399_v51 }
 0x204   :  { %v1401_v53 = vpop.f32.mrf.mxu0  ;;  %v1442_v54 = vpop.f32.mrf.mxu1 }
 0x205   :  { %1527 = vst [vmem:[#allocation10 + $0x8] sm:$0xff] %v1440_v31 }
 0x23e   :  { %v1478_v55 = vpop.f32.mrf.mxu0  ;;  %v1519_v56 = vpop.f32.mrf.mxu1 }
 0x23f   :  { %v1479_v57 = vadd.f32 %v1478_v55, %v713_v8 }
 0x240   :  { %v1480_v58 = vpop.f32.mrf.mxu0  ;;  %v1521_v59 = vpop.f32.mrf.mxu1 }
 0x241   :  { %v1520_v60 = vadd.f32 %v1519_v56, %v1479_v57  ;;  %v1481_v61 = vadd.f32 %v1480_v58, %v717_v11 }
 0x242   :  { %v1482_v62 = vpop.f32.mrf.mxu0  ;;  %v1523_v63 = vpop.f32.mrf.mxu1 }
 0x243   :  { %1528 = vst [vmem:[#allocation10 + $0x10] sm:$0xff] %v1520_v60  ;;  %v1522_v0 = vadd.f32 %v1521_v59, %v1481_v61 }
 0x244   :  { %v1483_v1 = vpop.f32.mrf.mxu0  ;;  %v1524_v2 = vpop.f32.mrf.mxu1 }
 0x245   :  { %1529 = vst [vmem:[#allocation10 + $0x18] sm:$0xff] %v1522_v0 }
 0x246   :  { %2125 = shalt.err (!%p2122_p10)
}
 0x247   :  { %1539 = dma.vmem_to_hbm [thread:$0]  %s1537_s13, 512, %s2238_s5, [#allocation4]  }
 0x248   :  { %2140 = dma.done.wait [#allocation4], 512  }
 0x249   :  { %2141 = vsyncadd [#allocation4], 4294966784 }
 0x24a   :  { %1543 = vsyncpa [#allocation3], 1 }
 0x24b   :  { %1544 = vsyncpa [#allocation6], 1 }
 0x24c   :  { %1545 = vsyncpa [#allocation9], 1 }
 0x24d   :  { %1546 = vsyncpa [#allocation4], 1 }

</bundles_post_ra>
